<compile_context>
chip_gen: v7x
topology: tpu7x:2x2x1
jax: 0.10.0
libtpu: 0.0.40
codegen_flags: <defaults>
</compile_context>

<pallas_src>
import functools

import jax
import jax.numpy as jnp
from jax.experimental import pallas as pl
from jax.experimental.pallas import tpu as pltpu

# ---- static model / problem sizes --------------------------------------
IN_FEATURES = 67     # fixed by the module
N_HIDDEN    = 32     # args.n_hidden
N_LAYERS    = 2      # args.n_layers
BATCH       = 2
N_NODES     = 8
LANES       = 128    # lane width; also the padded feature dim


def gcn_kernel(x_ref, adj_ref, w_emb_ref, w_fused_ref, w_gcn_ref, b_gcn_ref,
               w_fc_ref, pool_ref, b_fc_ref, out_ref, *, n_layers):
    """Whole-batch GCN forward in one kernel invocation.

    x_ref      : (B*N, F_pad)  bf16   folded, zero-padded node features
    adj_ref    : (B*N, B*N)    bf16   block-diagonal adjacency
    w_emb_ref  : (F_pad, H)    bf16
    w_fused_ref: (F_pad, H)    bf16   W_emb @ W_gcn[0]  (layer-0 fusion)
    w_gcn_ref  : (L-1, H, H)   bf16   GCN weights for layers 1..L-1
    b_gcn_ref  : (L, 1, H)     f32
    w_fc_ref   : (H, 1)        bf16
    pool_ref   : (128, B*N)    bf16   one-hot pooling matrix (row g sums graph g)
    b_fc_ref   : (1,)          f32    (SMEM scalar)
    out_ref    : (128, 1)      f32    logits column (first B rows valid)
    """
    xb  = x_ref[...]                                                     # (BN, F_pad) bf16
    adj = adj_ref[...]                                                   # (BN, BN)   bf16

    # Two independent MXU pushes off the same operand (shorter serial chain than
    # hw0 = (x @ W_emb) @ W_0):
    h  = jnp.dot(xb, w_emb_ref[...],   preferred_element_type=jnp.float32)   # (BN, H) f32
    hw = jnp.dot(xb, w_fused_ref[...], preferred_element_type=jnp.float32)   # (BN, H) f32

    for i in range(n_layers):                                            # static unroll
        if i > 0:
            hw = jnp.dot(h.astype(jnp.bfloat16), w_gcn_ref[i - 1],
                         preferred_element_type=jnp.float32)             # (BN, H)
        ah = jnp.dot(adj, hw.astype(jnp.bfloat16),
                     preferred_element_type=jnp.float32)                 # (BN, H)
        ah = ah + b_gcn_ref[i]                                           # (1, H) broadcast
        # residual + relu; element-wise math stays f32 (v5e has no bf16 VPU/EUP)
        h = jnp.maximum(jax.nn.sigmoid(ah) + h, 0.0)

    # Fused ReadOut(SumPooling) + fc_layer_GCN, entirely on the MXU:
    #   s[m]      = h[m] @ w_fc                      (per-node fc)
    #   logit[g]  = sum_{m in graph g} s[m]          (one-hot pooling dot)
    s = jnp.dot(h.astype(jnp.bfloat16), w_fc_ref[...],
                preferred_element_type=jnp.float32)                      # (BN, 1)
    logits = jnp.dot(pool_ref[...], s.astype(jnp.bfloat16),
                     preferred_element_type=jnp.float32)                 # (128, 1)
    # rows g >= B have all-zero pool rows -> they hold sigmoid(b_fc); wrapper slices [:B]
    out_ref[...] = jax.nn.sigmoid(logits + b_fc_ref[0])


@jax.jit
def gcn_forward(x, adj, w_emb, w_gcn, b_gcn, w_fc, b_fc):
    B, N, F = x.shape
    H = w_emb.shape[1]
    L = w_gcn.shape[0]
    BN = B * N
    f_pad = ((F + LANES - 1) // LANES) * LANES                           # 67 -> 128
    bf16 = jnp.bfloat16

    # --- prep: all fused under this jit (no per-graph update-slice loop) ----
    x_fold  = jnp.pad(x.reshape(BN, F), ((0, 0), (0, f_pad - F))).astype(bf16)
    w_emb_p = jnp.pad(w_emb, ((0, f_pad - F), (0, 0))).astype(bf16)
    # layer-0 weight fused into the embedding weight (f32 pre-multiply, then bf16)
    w_fused_p = jnp.pad(w_emb @ w_gcn[0], ((0, f_pad - F), (0, 0))).astype(bf16)
    # block-diagonal adjacency via one fused expression
    adj_bd = (jnp.eye(B, dtype=adj.dtype)[:, None, :, None]
              * adj[:, :, None, :]).reshape(BN, BN).astype(bf16)
    # one-hot pooling matrix: pool[g, m] = 1 iff node-row m belongs to graph g
    pool = (jnp.arange(LANES)[:, None] == (jnp.arange(BN)[None, :] // N)).astype(bf16)
    w_gcn_tail = (w_gcn[1:] if L > 1 else w_gcn[:1]).astype(bf16)        # dummy if L == 1
    b_gcn_s = b_gcn.reshape(L, 1, H).astype(jnp.float32)
    w_fc_b  = w_fc.astype(bf16)
    b_fc_s  = b_fc.reshape(1).astype(jnp.float32)

    flops = (2 * 2 * BN * f_pad * H            # embedding + fused layer-0 hw
             + 2 * L * BN * BN * H             # adj @ hw per layer (K = BN block-diag)
             + 2 * (L - 1) * BN * H * H        # hw for layers 1..L-1
             + 2 * BN * H                      # per-node fc
             + 2 * LANES * BN)                 # pooling dot
    bytes_accessed = sum(int(a.size) * a.dtype.itemsize for a in
                         (x_fold, adj_bd, w_emb_p, w_fused_p, w_gcn_tail,
                          b_gcn_s, w_fc_b, pool, b_fc_s)) + LANES * 4
    cost = pl.CostEstimate(flops=flops,
                           transcendentals=L * BN * H + LANES,
                           bytes_accessed=bytes_accessed)

    kernel = functools.partial(gcn_kernel, n_layers=L)

    out_col = pl.pallas_call(
        kernel,
        out_shape=jax.ShapeDtypeStruct((LANES, 1), jnp.float32),
        in_specs=[
            pl.BlockSpec(memory_space=pltpu.MemorySpace.VMEM),   # x (folded, padded)
            pl.BlockSpec(memory_space=pltpu.MemorySpace.VMEM),   # adj (block-diagonal)
            pl.BlockSpec(memory_space=pltpu.MemorySpace.VMEM),   # w_emb (padded)
            pl.BlockSpec(memory_space=pltpu.MemorySpace.VMEM),   # w_fused (padded)
            pl.BlockSpec(memory_space=pltpu.MemorySpace.VMEM),   # GCN weights 1..L-1
            pl.BlockSpec(memory_space=pltpu.MemorySpace.VMEM),   # stacked GCN biases
            pl.BlockSpec(memory_space=pltpu.MemorySpace.VMEM),   # fc weight (bf16)
            pl.BlockSpec(memory_space=pltpu.MemorySpace.VMEM),   # pooling matrix
            pl.BlockSpec(memory_space=pltpu.MemorySpace.SMEM),   # fc bias (scalar)
        ],
        out_specs=pl.BlockSpec(memory_space=pltpu.MemorySpace.VMEM),
        cost_estimate=cost,
    )(x_fold, adj_bd, w_emb_p, w_fused_p, w_gcn_tail, b_gcn_s, w_fc_b, pool, b_fc_s)

    return out_col[:B, 0]            # .squeeze(-1) on the (B, 1) logits


def gcn_reference(x, adj, w_emb, w_gcn, b_gcn, w_fc, b_fc, dot_dtype=jnp.float32):
    """Plain-JAX reference of the module semantics. `dot_dtype` mirrors the kernel's
    MXU input precision (bf16) for a tighter comparison; f32 gives module semantics."""
    c = lambda a: a.astype(dot_dtype)
    h = jnp.einsum("bnf,fh->bnh", c(x), c(w_emb), preferred_element_type=jnp.float32)
    for i in range(w_gcn.shape[0]):
        h_ori = h
        hw = jnp.einsum("bnh,hk->bnk", c(h), c(w_gcn[i]), preferred_element_type=jnp.float32)
        ah = jnp.einsum("bnm,bmk->bnk", c(adj), c(hw), preferred_element_type=jnp.float32)
        ah = ah + b_gcn[i][None, None, :]
        h = jnp.maximum(jax.nn.sigmoid(ah) + h_ori, 0.0)
    g = jnp.sum(h, axis=1)
    logit = jnp.dot(c(g), c(w_fc), preferred_element_type=jnp.float32) + b_fc
    return jax.nn.sigmoid(logit).reshape(-1)


if __name__ == "__main__":
    key = jax.random.PRNGKey(0)
    ks = jax.random.split(key, 8)

    B, N, F, H, L = BATCH, N_NODES, IN_FEATURES, N_HIDDEN, N_LAYERS

    # deterministic "checkpoint-free" parameter init (PyTorch-like scales)
    w_emb = jax.random.uniform(ks[0], (F, H), jnp.float32, -1.0, 1.0) / jnp.sqrt(F)
    w_gcn = jax.random.uniform(ks[1], (L, H, H), jnp.float32, -1.0, 1.0) / jnp.sqrt(H)
    b_gcn = jax.random.uniform(ks[2], (L, H), jnp.float32, -1.0, 1.0) / jnp.sqrt(H)
    w_fc  = jax.random.uniform(ks[3], (H, 1), jnp.float32, -1.0, 1.0) / jnp.sqrt(H)
    b_fc  = jax.random.uniform(ks[4], (1, 1), jnp.float32, -1.0, 1.0) / jnp.sqrt(H)

    # deterministic example inputs
    x = jax.random.normal(ks[5], (B, N, F), jnp.float32)
    a = jax.random.uniform(ks[6], (B, N, N), jnp.float32)
    adj = 0.5 * (a + jnp.swapaxes(a, -1, -2)) + jnp.eye(N)[None]   # symmetric + self loops
    adj = adj / jnp.sum(adj, axis=-1, keepdims=True)               # row-normalized

    out = jax.block_until_ready(gcn_forward(x, adj, w_emb, w_gcn, b_gcn, w_fc, b_fc))
    assert out.shape == (B,)

    # check against a reference using bf16 MXU inputs (kernel's precision regime)
    ref_bf16 = gcn_reference(x, adj, w_emb, w_gcn, b_gcn, w_fc, b_fc, dot_dtype=jnp.bfloat16)
    assert jnp.allclose(out, ref_bf16, rtol=5e-3, atol=5e-3), (out, ref_bf16)

    # loose check against the full-f32 module semantics
    ref_f32 = gcn_reference(x, adj, w_emb, w_gcn, b_gcn, w_fc, b_fc, dot_dtype=jnp.float32)
    assert jnp.allclose(out, ref_f32, rtol=2e-2, atol=2e-2), (out, ref_f32)

    print("KERNEL_OK")
</pallas_src>

<mosaic_0001>
module attributes {stable_mosaic.version = 11 : i64} {
  func.func @gcn_kernel(%arg0: memref<16x128xbf16, #tpu.memory_space<vmem>>, %arg1: memref<16x16xbf16, #tpu.memory_space<vmem>>, %arg2: memref<128x32xbf16, #tpu.memory_space<vmem>>, %arg3: memref<128x32xbf16, #tpu.memory_space<vmem>>, %arg4: memref<1x32x32xbf16, #tpu.memory_space<vmem>>, %arg5: memref<2x1x32xf32, #tpu.memory_space<vmem>>, %arg6: memref<32x1xbf16, #tpu.memory_space<vmem>>, %arg7: memref<128x16xbf16, #tpu.memory_space<vmem>>, %arg8: memref<1xf32, #tpu.memory_space<smem>>, %arg9: memref<128x1xf32, #tpu.memory_space<vmem>>) attributes {dimension_semantics = [], scalar_prefetch = 0 : i64, scratch_operands = 0 : i64, tpu.core_type = #tpu.core_type<tc>} {
    %c0 = arith.constant 0 : index
    %c0_0 = arith.constant 0 : index
    %0 = vector.load %arg0[%c0, %c0_0] : memref<16x128xbf16, #tpu.memory_space<vmem>>, vector<16x128xbf16>
    %c0_1 = arith.constant 0 : index
    %c0_2 = arith.constant 0 : index
    %1 = vector.load %arg1[%c0_1, %c0_2] : memref<16x16xbf16, #tpu.memory_space<vmem>>, vector<16x16xbf16>
    %c0_3 = arith.constant 0 : index
    %c0_4 = arith.constant 0 : index
    %2 = vector.load %arg2[%c0_3, %c0_4] : memref<128x32xbf16, #tpu.memory_space<vmem>>, vector<128x32xbf16>
    %cst = arith.constant dense<0.000000e+00> : vector<16x32xf32>
    %3 = tpu.matmul %0, %2, %cst {dimension_numbers = #tpu.dot_dimension_numbers<[1], [0], [0], [1], [0, 0, 1, 1], [], []>} : vector<16x128xbf16>, vector<128x32xbf16>, vector<16x32xf32> -> vector<16x32xf32>
    %c0_5 = arith.constant 0 : index
    %c0_6 = arith.constant 0 : index
    %4 = vector.load %arg3[%c0_5, %c0_6] : memref<128x32xbf16, #tpu.memory_space<vmem>>, vector<128x32xbf16>
    %cst_7 = arith.constant dense<0.000000e+00> : vector<16x32xf32>
    %5 = tpu.matmul %0, %4, %cst_7 {dimension_numbers = #tpu.dot_dimension_numbers<[1], [0], [0], [1], [0, 0, 1, 1], [], []>} : vector<16x128xbf16>, vector<128x32xbf16>, vector<16x32xf32> -> vector<16x32xf32>
    %6 = arith.truncf %5 : vector<16x32xf32> to vector<16x32xbf16>
    %cst_8 = arith.constant dense<0.000000e+00> : vector<16x32xf32>
    %7 = tpu.matmul %1, %6, %cst_8 {dimension_numbers = #tpu.dot_dimension_numbers<[1], [0], [0], [1], [0, 0, 1, 1], [], []>} : vector<16x16xbf16>, vector<16x32xbf16>, vector<16x32xf32> -> vector<16x32xf32>
    %c0_9 = arith.constant 0 : index
    %c0_10 = arith.constant 0 : index
    %c0_11 = arith.constant 0 : index
    %8 = vector.load %arg5[%c0_9, %c0_10, %c0_11] : memref<2x1x32xf32, #tpu.memory_space<vmem>>, vector<1x1x32xf32>
    %9 = vector.shape_cast %8 : vector<1x1x32xf32> to vector<1x32xf32>
    %10 = vector.broadcast %9 : vector<1x32xf32> to vector<16x32xf32>
    %11 = arith.addf %7, %10 : vector<16x32xf32>
    %12 = arith.negf %11 : vector<16x32xf32>
    %13 = math.exp %12 : vector<16x32xf32>
    %cst_12 = arith.constant 1.000000e+00 : f32
    %14 = vector.broadcast %cst_12 : f32 to vector<16x32xf32>
    %15 = arith.addf %14, %13 : vector<16x32xf32>
    %16 = arith.divf %14, %15 : vector<16x32xf32>
    %17 = arith.addf %16, %3 : vector<16x32xf32>
    %cst_13 = arith.constant 0.000000e+00 : f32
    %18 = vector.broadcast %cst_13 : f32 to vector<16x32xf32>
    %19 = arith.maximumf %17, %18 : vector<16x32xf32>
    %20 = arith.truncf %19 : vector<16x32xf32> to vector<16x32xbf16>
    %c0_14 = arith.constant 0 : index
    %c0_15 = arith.constant 0 : index
    %c0_16 = arith.constant 0 : index
    %21 = vector.load %arg4[%c0_14, %c0_15, %c0_16] : memref<1x32x32xbf16, #tpu.memory_space<vmem>>, vector<1x32x32xbf16>
    %22 = vector.shape_cast %21 : vector<1x32x32xbf16> to vector<32x32xbf16>
    %cst_17 = arith.constant dense<0.000000e+00> : vector<16x32xf32>
    %23 = tpu.matmul %20, %22, %cst_17 {dimension_numbers = #tpu.dot_dimension_numbers<[1], [0], [0], [1], [0, 0, 1, 1], [], []>} : vector<16x32xbf16>, vector<32x32xbf16>, vector<16x32xf32> -> vector<16x32xf32>
    %24 = arith.truncf %23 : vector<16x32xf32> to vector<16x32xbf16>
    %cst_18 = arith.constant dense<0.000000e+00> : vector<16x32xf32>
    %25 = tpu.matmul %1, %24, %cst_18 {dimension_numbers = #tpu.dot_dimension_numbers<[1], [0], [0], [1], [0, 0, 1, 1], [], []>} : vector<16x16xbf16>, vector<16x32xbf16>, vector<16x32xf32> -> vector<16x32xf32>
    %c1 = arith.constant 1 : index
    %c0_19 = arith.constant 0 : index
    %c0_20 = arith.constant 0 : index
    %26 = vector.load %arg5[%c1, %c0_19, %c0_20] : memref<2x1x32xf32, #tpu.memory_space<vmem>>, vector<1x1x32xf32>
    %27 = vector.shape_cast %26 : vector<1x1x32xf32> to vector<1x32xf32>
    %28 = vector.broadcast %27 : vector<1x32xf32> to vector<16x32xf32>
    %29 = arith.addf %25, %28 : vector<16x32xf32>
    %30 = arith.negf %29 : vector<16x32xf32>
    %31 = math.exp %30 : vector<16x32xf32>
    %cst_21 = arith.constant 1.000000e+00 : f32
    %32 = vector.broadcast %cst_21 : f32 to vector<16x32xf32>
    %33 = arith.addf %32, %31 : vector<16x32xf32>
    %34 = arith.divf %32, %33 : vector<16x32xf32>
    %35 = arith.addf %34, %19 : vector<16x32xf32>
    %cst_22 = arith.constant 0.000000e+00 : f32
    %36 = vector.broadcast %cst_22 : f32 to vector<16x32xf32>
    %37 = arith.maximumf %35, %36 : vector<16x32xf32>
    %38 = arith.truncf %37 : vector<16x32xf32> to vector<16x32xbf16>
    %c0_23 = arith.constant 0 : index
    %c0_24 = arith.constant 0 : index
    %39 = vector.load %arg6[%c0_23, %c0_24] : memref<32x1xbf16, #tpu.memory_space<vmem>>, vector<32x1xbf16>
    %cst_25 = arith.constant dense<0.000000e+00> : vector<16x1xf32>
    %40 = tpu.matmul %38, %39, %cst_25 {dimension_numbers = #tpu.dot_dimension_numbers<[1], [0], [0], [1], [0, 0, 1, 1], [], []>} : vector<16x32xbf16>, vector<32x1xbf16>, vector<16x1xf32> -> vector<16x1xf32>
    %c0_26 = arith.constant 0 : index
    %c0_27 = arith.constant 0 : index
    %41 = vector.load %arg7[%c0_26, %c0_27] : memref<128x16xbf16, #tpu.memory_space<vmem>>, vector<128x16xbf16>
    %42 = arith.truncf %40 : vector<16x1xf32> to vector<16x1xbf16>
    %cst_28 = arith.constant dense<0.000000e+00> : vector<128x1xf32>
    %43 = tpu.matmul %41, %42, %cst_28 {dimension_numbers = #tpu.dot_dimension_numbers<[1], [0], [0], [1], [0, 0, 1, 1], [], []>} : vector<128x16xbf16>, vector<16x1xbf16>, vector<128x1xf32> -> vector<128x1xf32>
    %c0_29 = arith.constant 0 : index
    %44 = memref.load %arg8[%c0_29] : memref<1xf32, #tpu.memory_space<smem>>
    %45 = vector.broadcast %44 : f32 to vector<128x1xf32>
    %46 = arith.addf %43, %45 : vector<128x1xf32>
    %47 = arith.negf %46 : vector<128x1xf32>
    %48 = math.exp %47 : vector<128x1xf32>
    %cst_30 = arith.constant 1.000000e+00 : f32
    %49 = vector.broadcast %cst_30 : f32 to vector<128x1xf32>
    %50 = arith.addf %49, %48 : vector<128x1xf32>
    %51 = arith.divf %49, %50 : vector<128x1xf32>
    %c0_31 = arith.constant 0 : index
    %c0_32 = arith.constant 0 : index
    %52 = vector.load %arg9[%c0_31, %c0_32] : memref<128x1xf32, #tpu.memory_space<vmem>>, vector<128x1xf32>
    tpu.vector_store %arg9[%c0_31, %c0_32], %51 {strides = array<i32>} : memref<128x1xf32, #tpu.memory_space<vmem>>, vector<128x1xf32>,
    return
  }
}

</mosaic_0001>

<bundles_post_ra>
// kernel: gcn_forward.1
= control target key start
LH: loop header
LB: loop body
LE: loop exit
PB: predicated region body
PF: predicated region fallthrough
CT: control target
= control target key end

     0   :  { %v1116_v0 = vmov 0.0   ;;  %vm1117_vm0 = vmmov 0   ;;  %vm267_vm1 = vcmask 130048   ;;  %vm345_vm2 = vcmask 261120   ;;  %s1395_s3 = inlined_call_operand.vmem [shape: bf16[128,32], index: 3, kind: input, shape index: {}]   ;;  %s1396_s2 = inlined_call_operand.vmem [shape: bf16[128,32], index: 2, kind: input, shape index: {}]   ;;  %s1397_s0 = inlined_call_operand.vmem [shape: bf16[16,128], index: 0, kind: input, shape index: {}]   ;;  %s1398_s1 = inlined_call_operand.vmem [shape: bf16[16,16], index: 1, kind: input, shape index: {}]   ;;  %s1399_s4 = inlined_call_operand.vmem [shape: bf16[1,32,32], index: 4, kind: input, shape index: {}]   ;;  %s1400_s5 = inlined_call_operand.vmem [shape: f32[2,1,32], index: 5, kind: input, shape index: {}]   ;;  %s1401_s6 = inlined_call_operand.vmem [shape: bf16[32,1], index: 6, kind: input, shape index: {}]   ;;  %s1402_s7 = inlined_call_operand.vmem [shape: bf16[128,16], index: 7, kind: input, shape index: {}]   ;;  %s1403_s8 = inlined_call_operand.<no memory space> [shape: f32[1], index: 8, kind: input, shape index: {}]   ;;  %s1404_s9 = inlined_call_operand.vmem [shape: f32[128,1], index: 9, kind: output, shape index: {}]  }
   0x1   :  { %936 = vmatprep.subr.bf16.mxu1 %v1116_v0  ;;  %v1006_v1 = vld [vmem:[%s1395_s3] sm:$0xff]   ;;  %952 = vmatprep.mubr.msk.bf16.mxu1 %vm1117_vm0, %v1116_v0  ;;  %v1007_v2 = vld [vmem:[%s1395_s3 + $0x8] sm:$0xff]   ;;  %v1008_v3 = vld [vmem:[%s1395_s3 + $0x10] sm:$0xff]   ;;  %vm793_vm3 = vcmask 7168  }
   0x2   :  { %916 = vmatprep.subr.bf16.mxu0 %v1116_v0  ;;  %932 = vmatprep.mubr.msk.bf16.mxu0 %vm1117_vm0, %v1116_v0  ;;  %v1015_v4 = vld [vmem:[%s1396_s2] sm:$0xff]   ;;  %v1009_v5 = vld [vmem:[%s1395_s3 + $0x18] sm:$0xff]   ;;  %v1016_v6 = vld [vmem:[%s1396_s2 + $0x8] sm:$0xff]  }
   0x3   :  { %937 = vmatpush3.bf16.msra.mxu1 %v1006_v1  ;;  %917 = vmatpush3.bf16.msra.mxu0 %v1015_v4  ;;  %v1010_v7 = vld [vmem:[%s1395_s3 + $0x20] sm:$0xff]   ;;  %v1017_v8 = vld [vmem:[%s1396_s2 + $0x10] sm:$0xff]   ;;  %v1011_v9 = vld [vmem:[%s1395_s3 + $0x28] sm:$0xff]  }
   0x4   :  { %938 = vmatprep.subr.bf16.mxu1 %v1116_v0  ;;  %918 = vmatprep.subr.bf16.mxu0 %v1116_v0  ;;  %v1018_v10 = vld [vmem:[%s1396_s2 + $0x18] sm:$0xff]   ;;  %v1012_v11 = vld [vmem:[%s1395_s3 + $0x30] sm:$0xff]   ;;  %v1019_v12 = vld [vmem:[%s1396_s2 + $0x20] sm:$0xff]  }
   0x5   :  { %v1013_v13 = vld [vmem:[%s1395_s3 + $0x38] sm:$0xff]   ;;  %v1020_v14 = vld [vmem:[%s1396_s2 + $0x28] sm:$0xff]   ;;  %v1014_v15 = vld [vmem:[%s1397_s0] sm:$0xff]  }
   0x6   :  { %v1021_v16 = vld [vmem:[%s1396_s2 + $0x30] sm:$0xff]   ;;  %v1022_v17 = vld [vmem:[%s1396_s2 + $0x38] sm:$0xff]   ;;  %v1023_v23 = vld [vmem:[%s1398_s1] sm:$0xff]  }
   0x7   :  { %939 = vmatpush3.bf16.msra.mxu1 %v1007_v2  ;;  %919 = vmatpush3.bf16.msra.mxu0 %v1016_v6  ;;  %v1024_v28 = vld [vmem:[%s1399_s4] sm:$0xff]   ;;  %v1025_v29 = vld [vmem:[%s1399_s4 + $0x8] sm:$0xff]  }
   0x8   :  { %940 = vmatprep.subr.bf16.mxu1 %v1116_v0  ;;  %920 = vmatprep.subr.bf16.mxu0 %v1116_v0  ;;  %v831_v30 = vld [vmem:[%s1400_s5] ss:$0 sm:$0xff]  ;;  %v1027_v56 = vld [vmem:[%s1401_s6 + $0x8] sm:$0xff]   ;;  %v840_v57 = vld [vmem:[%s1400_s5 + $0x1] ss:$0 sm:$0xff] }
   0x9   :  { %v1026_v55 = vld [vmem:[%s1401_s6] sm:$0xff]  }
   0xb   :  { %941 = vmatpush3.bf16.msra.mxu1 %v1008_v3  ;;  %921 = vmatpush3.bf16.msra.mxu0 %v1017_v8 }
   0xc   :  { %942 = vmatprep.subr.bf16.mxu1 %v1116_v0  ;;  %922 = vmatprep.subr.bf16.mxu0 %v1116_v0 }
   0xf   :  { %943 = vmatpush3.bf16.msra.mxu1 %v1009_v5  ;;  %923 = vmatpush3.bf16.msra.mxu0 %v1018_v10 }
  0x10   :  { %944 = vmatprep.subr.bf16.mxu1 %v1116_v0  ;;  %924 = vmatprep.subr.bf16.mxu0 %v1116_v0 }
  0x13   :  { %945 = vmatpush3.bf16.msra.mxu1 %v1010_v7  ;;  %925 = vmatpush3.bf16.msra.mxu0 %v1019_v12 }
  0x14   :  { %946 = vmatprep.subr.bf16.mxu1 %v1116_v0  ;;  %926 = vmatprep.subr.bf16.mxu0 %v1116_v0 }
  0x17   :  { %947 = vmatpush3.bf16.msra.mxu1 %v1011_v9  ;;  %927 = vmatpush3.bf16.msra.mxu0 %v1020_v14  ;;  %v1029_v14 = vld [vmem:[%s1402_s7 + $0x20] sm:$0xff]  }
  0x18   :  { %948 = vmatprep.subr.bf16.mxu1 %v1116_v0  ;;  %928 = vmatprep.subr.bf16.mxu0 %v1116_v0 }
  0x1b   :  { %949 = vmatpush3.bf16.msra.mxu1 %v1012_v11  ;;  %929 = vmatpush3.bf16.msra.mxu0 %v1021_v16 }
  0x1c   :  { %950 = vmatprep.subr.bf16.mxu1 %v1116_v0  ;;  %930 = vmatprep.subr.bf16.mxu0 %v1116_v0 }
  0x1f   :  { %951 = vmatpush3.bf16.msra.mxu1 %v1013_v13  ;;  %931 = vmatpush3.bf16.msra.mxu0 %v1022_v17  ;;  %v1028_v13 = vld [vmem:[%s1402_s7] sm:$0xff]  }
  0x20   :  { %962 = vmatprep.subr.bf16.mxu1 %v1116_v0  ;;  %956 = vmatprep.subr.bf16.mxu0 %v1116_v0 }
  0x22   :  { %953 = vmatmul.mubr.bf16.vlgmr.msra.gmra.mrb[0].mxu1 %v1014_v15  ;;  %933 = vmatmul.mubr.bf16.vlgmr.msra.gmra.mrb[0].mxu0 %v1014_v15 }
  0x23   :  { %966 = vmatprep.mubr.msk.bf16.mxu1 %vm1117_vm0, %v1116_v0  ;;  %958 = vmatprep.mubr.msk.bf16.mxu0 %vm1117_vm0, %v1116_v0 }
  0x24   :  { %963 = vmatpush3.bf16.msra.mxu1 %v1024_v28 }
  0x25   :  { %964 = vmatprep.subr.bf16.mxu1 %v1116_v0 }
  0x28   :  { %965 = vmatpush3.bf16.msra.mxu1 %v1025_v29 }
  0x29   :  { %976 = vmatprep.subr.bf16.mxu1 %v1116_v0 }
  0xf5   :  { %v247_v18 = vpop.f32.mrb[0].mxu1  ;;  %v142_v24 = vpop.f32.mrb[0].mxu0 }
  0xf6   :  { %v954_v19 = vpop.f32.mrb[1].mxu1  ;;  %v934_v25 = vpop.f32.mrb[1].mxu0 }
  0xf7   :  { %v250_v20 = vpop.f32.mrb[2].mxu1  ;;  %v145_v26 = vpop.f32.mrb[2].mxu0  ;;  %v1035_v25 = vld [vmem:[%s1402_s7 + $0x38] sm:$0xff]  }
  0xf8   :  { %v254_v21 = vpack.c.bf16 %v250_v20, %v247_v18  ;;  %v955_v22 = vpop.f32.mrb[3].mxu1  ;;  %v935_v27 = vpop.f32.mrb[3].mxu0  ;;  %v1030_v20 = vld [vmem:[%s1402_s7 + $0x8] sm:$0xff]  }
  0xf9   :  { %v1032_v22 = vld [vmem:[%s1402_s7 + $0x10] sm:$0xff]  }
  0xfa   :  { %957 = vmatpush3.bf16.msra.mxu0 %v254_v21  ;;  %v1031_v21 = vld [vmem:[%s1402_s7 + $0x28] sm:$0xff]  }
  0xfb   :  { %970 = vmatprep.subr.bf16.mxu0 %v1116_v0 }
  0xfd   :  { %959 = vmatmul.mubr.msk.bf16.vlgmr.msra.gmra.mrb[4].mxu0 %vm267_vm1, %v1023_v23 }
  0xfe   :  { %972 = vmatprep.mubr.msk.bf16.mxu0 %vm1117_vm0, %v1116_v0 }
 0x1d0   :  { %v305_v31 = vpop.f32.mrb[4].mxu0 }
 0x1d1   :  { %v306_v32 = vadd.f32 %v831_v30, %v305_v31  ;;  %v960_v33 = vpop.f32.mrb[5].mxu0 }
 0x1d2   :  { %v308_v34 = vpop.f32.mrb[6].mxu0 }
 0x1d3   :  { %v834_v35 = vmul.f32 -1.442695, %v306_v32  ;;  %v309_v36 = vadd.f32 %v831_v30, %v308_v34  ;;  %v961_v37 = vpop.f32.mrb[7].mxu0 }
 0x1d5   :  { %1036 = vpow2.f32 %v834_v35  ;;  %v835_v38 = vmul.f32 -1.442695, %v309_v36 }
 0x1d7   :  { %1038 = vpow2.f32 %v835_v38 }
 0x1df   :  { %v1037_v39 = vpop.eup %1036 }
 0x1e0   :  { %v318_v40 = vadd.f32 1.0, %v1037_v39 }
 0x1e1   :  { %v1039_v41 = vpop.eup %1038 }
 0x1e2   :  { %1040 = vrcp.f32 %v318_v40  ;;  %v319_v42 = vadd.f32 1.0, %v1039_v41 }
 0x1e4   :  { %1042 = vrcp.f32 %v319_v42 }
 0x1ec   :  { %v1041_v43 = vpop.eup %1040 }
 0x1ed   :  { %v324_v44 = vadd.f32 %v1041_v43, %v142_v24  ;;  %v1034_v24 = vld [vmem:[%s1402_s7 + $0x18] sm:$0xff]  }
 0x1ee   :  { %v1043_v45 = vpop.eup %1042 }
 0x1ef   :  { %v325_v46 = vadd.f32 %v1043_v45, %v145_v26  ;;  %v326_v47 = vmax.f32 %v324_v44, 0.0  ;;  %v1313_v26 = vstv %s1403_s8 }
 0x1f1   :  { %v327_v48 = vmax.f32 %v325_v46, 0.0 }
 0x1f3   :  { %v328_v49 = vpack.c.bf16 %v327_v48, %v326_v47 }
 0x1f5   :  { %967 = vmatmul.mubr.msk.bf16.vlgmr.msra.gmra.mrb[4].mxu1 %vm345_vm2, %v328_v49 }
 0x1f6   :  { %980 = vmatprep.mubr.msk.bf16.mxu1 %vm1117_vm0, %v1116_v0  ;;  %977 = vmatpush3.bf16.msra.mxu1 %v1026_v55 }
 0x1f7   :  { %978 = vmatprep.subr.bf16.mxu1 %v1116_v0 }
 0x1fa   :  { %979 = vmatpush3.bf16.msra.mxu1 %v1027_v56 }
 0x2c8   :  { %v383_v50 = vpop.f32.mrb[4].mxu1 }
 0x2c9   :  { %v968_v51 = vpop.f32.mrb[5].mxu1 }
 0x2ca   :  { %v386_v52 = vpop.f32.mrb[6].mxu1 }
 0x2cb   :  { %v390_v53 = vpack.c.bf16 %v386_v52, %v383_v50  ;;  %v969_v54 = vpop.f32.mrb[7].mxu1 }
 0x2cd   :  { %971 = vmatpush3.bf16.msra.mxu0 %v390_v53 }
 0x2d0   :  { %973 = vmatmul.mubr.msk.bf16.vlgmr.msra.gmra.mrb[8].mxu0 %vm267_vm1, %v1023_v23  ;;  %v1033_v23 = vld [vmem:[%s1402_s7 + $0x30] sm:$0xff]  }
 0x2d1   :  { %986 = vmatprep.mubr.msk.bf16.mxu0 %vm267_vm1, %v1028_v13 }
 0x3a3   :  { %v433_v58 = vpop.f32.mrb[8].mxu0 }
 0x3a4   :  { %v434_v59 = vadd.f32 %v840_v57, %v433_v58  ;;  %v974_v60 = vpop.f32.mrb[9].mxu0 }
 0x3a5   :  { %v436_v61 = vpop.f32.mrb[10].mxu0 }
 0x3a6   :  { %v842_v62 = vmul.f32 -1.442695, %v434_v59  ;;  %v437_v63 = vadd.f32 %v840_v57, %v436_v61  ;;  %v975_v1 = vpop.f32.mrb[11].mxu0 }
 0x3a8   :  { %1044 = vpow2.f32 %v842_v62  ;;  %v843_v2 = vmul.f32 -1.442695, %v437_v63 }
 0x3aa   :  { %1046 = vpow2.f32 %v843_v2 }
 0x3b2   :  { %v1045_v3 = vpop.eup %1044 }
 0x3b3   :  { %v446_v4 = vadd.f32 1.0, %v1045_v3 }
 0x3b4   :  { %v1047_v5 = vpop.eup %1046 }
 0x3b5   :  { %1048 = vrcp.f32 %v446_v4  ;;  %v447_v0 = vadd.f32 1.0, %v1047_v5 }
 0x3b7   :  { %1050 = vrcp.f32 %v447_v0 }
 0x3bf   :  { %v1049_v6 = vpop.eup %1048 }
 0x3c0   :  { %v452_v7 = vadd.f32 %v1049_v6, %v326_v47 }
 0x3c1   :  { %v1051_v8 = vpop.eup %1050 }
 0x3c2   :  { %v453_v9 = vadd.f32 %v1051_v8, %v327_v48  ;;  %v454_v10 = vmax.f32 %v452_v7, 0.0 }
 0x3c4   :  { %v455_v11 = vmax.f32 %v453_v9, 0.0 }
 0x3c6   :  { %v456_v12 = vpack.c.bf16 %v455_v11, %v454_v10 }
 0x3c8   :  { %981 = vmatmul.mubr.msk.bf16.vlgmr.msra.gmra.mrb[8].mxu1 %vm345_vm2, %v456_v12 }
 0x3c9   :  { %994 = vmatprep.mubr.msk.bf16.mxu1 %vm267_vm1, %v1029_v14 }
 0x49b   :  { %v510_v15 = vpop.f32.mrb[8].mxu1 }
 0x49c   :  { %v982_v16 = vpop.f32.mrb[9].mxu1 }
 0x49d   :  { %v513_v17 = vpop.f32.mrb[10].mxu1 }
 0x49e   :  { %v533_v18 = vpack.c.bf16 %v513_v17, %v510_v15  ;;  %v983_v19 = vpop.f32.mrb[11].mxu1 }
 0x4a0   :  { %984 = vmatprep.subr.bf16.mxu0 %v533_v18  ;;  %1002 = vmatprep.subr.bf16.mxu1 %v533_v18 }
 0x4a1   :  { %985 = vmatpush3.bf16.msra.mxu0 %v533_v18  ;;  %1003 = vmatpush3.bf16.msra.mxu1 %v533_v18 }
 0x4a4   :  { %987 = vmatmul.mubr.msk.bf16.vlgmr.msra.gmra.mrb[12].mxu0 %vm267_vm1, %v1030_v20  ;;  %995 = vmatmul.mubr.msk.bf16.vlgmr.msra.gmra.mrb[12].mxu1 %vm267_vm1, %v1031_v21 }
 0x4a5   :  { %990 = vmatprep.mubr.msk.bf16.mxu0 %vm267_vm1, %v1032_v22  ;;  %998 = vmatprep.mubr.msk.bf16.mxu1 %vm267_vm1, %v1033_v23 }
 0x4ac   :  { %991 = vmatmul.mubr.msk.bf16.gmra.mrb[16].mxu0 %vm267_vm1, %v1034_v24  ;;  %999 = vmatmul.mubr.msk.bf16.gmra.mrb[16].mxu1 %vm267_vm1, %v1035_v25 }
 0x577   :  { %v988_v27 = vpop.f32.mrb[12].mxu0  ;;  %v996_v28 = vpop.f32.mrb[12].mxu1 }
 0x578   :  { %v643_v29 = vadd.f32 %v988_v27, %v1313_v26  ;;  %v675_v30 = vadd.f32 %v996_v28, %v1313_v26  ;;  %v634_v31 = vpop.f32.mrb[13].mxu0  ;;  %v666_v32 = vpop.f32.mrb[13].mxu1 }
 0x579   :  { %v635_v33 = vadd.f32 %v634_v31, %v1313_v26  ;;  %v667_v34 = vadd.f32 %v666_v32, %v1313_v26  ;;  %v989_v35 = vpop.f32.mrb[14].mxu0  ;;  %v997_v36 = vpop.f32.mrb[14].mxu1 }
 0x57a   :  { %v865_v37 = vmul.f32 -1.442695, %v643_v29  ;;  %v873_v38 = vmul.f32 -1.442695, %v675_v30  ;;  %v646_v39 = vadd.f32 %v989_v35, %v1313_v26  ;;  %v678_v40 = vadd.f32 %v997_v36, %v1313_v26  ;;  %v637_v41 = vpop.f32.mrb[15].mxu0  ;;  %v669_v42 = vpop.f32.mrb[15].mxu1 }
 0x57b   :  { %v863_v43 = vmul.f32 -1.442695, %v635_v33  ;;  %v871_v44 = vmul.f32 -1.442695, %v667_v34  ;;  %v638_v45 = vadd.f32 %v637_v41, %v1313_v26  ;;  %v670_v46 = vadd.f32 %v669_v42, %v1313_v26 }
 0x57c   :  { %1052 = vpow2.f32 %v865_v37  ;;  %v866_v47 = vmul.f32 -1.442695, %v646_v39  ;;  %v874_v48 = vmul.f32 -1.442695, %v678_v40 }
 0x57d   :  { %1054 = vpow2.f32 %v873_v38  ;;  %v864_v49 = vmul.f32 -1.442695, %v638_v45  ;;  %v872_v50 = vmul.f32 -1.442695, %v670_v46 }
 0x57e   :  { %1056 = vpow2.f32 %v863_v43 }
 0x57f   :  { %1058 = vpow2.f32 %v871_v44  ;;  %v992_v51 = vpop.f32.mrb[16].mxu0  ;;  %v1000_v52 = vpop.f32.mrb[16].mxu1 }
 0x580   :  { %1060 = vpow2.f32 %v866_v47  ;;  %v659_v53 = vadd.f32 %v992_v51, %v1313_v26  ;;  %v691_v54 = vadd.f32 %v1000_v52, %v1313_v26  ;;  %v650_v55 = vpop.f32.mrb[17].mxu0  ;;  %v682_v56 = vpop.f32.mrb[17].mxu1 }
 0x581   :  { %1062 = vpow2.f32 %v874_v48  ;;  %v651_v57 = vadd.f32 %v650_v55, %v1313_v26  ;;  %v683_v58 = vadd.f32 %v682_v56, %v1313_v26  ;;  %v993_v59 = vpop.f32.mrb[18].mxu0  ;;  %v1001_v60 = vpop.f32.mrb[18].mxu1 }
 0x582   :  { %1064 = vpow2.f32 %v864_v49  ;;  %v869_v61 = vmul.f32 -1.442695, %v659_v53  ;;  %v877_v62 = vmul.f32 -1.442695, %v691_v54  ;;  %v662_v63 = vadd.f32 %v993_v59, %v1313_v26  ;;  %v653_v1 = vpop.f32.mrb[19].mxu0  ;;  %v685_v2 = vpop.f32.mrb[19].mxu1 }
 0x583   :  { %1066 = vpow2.f32 %v872_v50  ;;  %v867_v3 = vmul.f32 -1.442695, %v651_v57  ;;  %v875_v4 = vmul.f32 -1.442695, %v683_v58  ;;  %v694_v22 = vadd.f32 %v1001_v60, %v1313_v26 }
 0x584   :  { %1068 = vpow2.f32 %v869_v61  ;;  %v870_v5 = vmul.f32 -1.442695, %v662_v63  ;;  %v654_v25 = vadd.f32 %v653_v1, %v1313_v26  ;;  %v686_v29 = vadd.f32 %v685_v2, %v1313_v26 }
 0x585   :  { %1070 = vpow2.f32 %v877_v62  ;;  %v878_v34 = vmul.f32 -1.442695, %v694_v22 }
 0x586   :  { %v1053_v0 = vpop.eup %1052  ;;  %1072 = vpow2.f32 %v867_v3  ;;  %v868_v37 = vmul.f32 -1.442695, %v654_v25  ;;  %v876_v26 = vmul.f32 -1.442695, %v686_v29 }
 0x587   :  { %v1055_v6 = vpop.eup %1054  ;;  %v747_v7 = vadd.f32 1.0, %v1053_v0  ;;  %1074 = vpow2.f32 %v875_v4 }
 0x588   :  { %v1057_v8 = vpop.eup %1056  ;;  %v755_v9 = vadd.f32 1.0, %v1055_v6  ;;  %1076 = vpow2.f32 %v870_v5 }
 0x589   :  { %v1059_v10 = vpop.eup %1058  ;;  %1078 = vrcp.f32 %v747_v7  ;;  %v745_v11 = vadd.f32 1.0, %v1057_v8 }
 0x58a   :  { %v1061_v12 = vpop.eup %1060  ;;  %1080 = vrcp.f32 %v755_v9  ;;  %v753_v13 = vadd.f32 1.0, %v1059_v10 }
 0x58b   :  { %v1063_v14 = vpop.eup %1062  ;;  %1082 = vrcp.f32 %v745_v11  ;;  %v748_v15 = vadd.f32 1.0, %v1061_v12 }
 0x58c   :  { %v1065_v16 = vpop.eup %1064  ;;  %1084 = vrcp.f32 %v753_v13  ;;  %v756_v17 = vadd.f32 1.0, %v1063_v14 }
 0x58d   :  { %v1067_v18 = vpop.eup %1066  ;;  %1086 = vrcp.f32 %v748_v15  ;;  %v746_v19 = vadd.f32 1.0, %v1065_v16 }
 0x58e   :  { %v1069_v20 = vpop.eup %1068  ;;  %1088 = vrcp.f32 %v756_v17  ;;  %v754_v21 = vadd.f32 1.0, %v1067_v18 }
 0x58f   :  { %v1071_v23 = vpop.eup %1070  ;;  %1090 = vrcp.f32 %v746_v19  ;;  %v751_v24 = vadd.f32 1.0, %v1069_v20 }
 0x590   :  { %v1073_v27 = vpop.eup %1072  ;;  %1092 = vrcp.f32 %v754_v21  ;;  %v759_v28 = vadd.f32 1.0, %v1071_v23 }
 0x591   :  { %v1075_v30 = vpop.eup %1074  ;;  %1094 = vrcp.f32 %v751_v24  ;;  %v749_v31 = vadd.f32 1.0, %v1073_v27 }
 0x592   :  { %v1077_v32 = vpop.eup %1076  ;;  %1096 = vrcp.f32 %v759_v28  ;;  %v757_v33 = vadd.f32 1.0, %v1075_v30 }
 0x593   :  { %v1079_v35 = vpop.eup %1078  ;;  %1098 = vrcp.f32 %v749_v31  ;;  %v752_v36 = vadd.f32 1.0, %v1077_v32 }
 0x594   :  { %v1081_v38 = vpop.eup %1080  ;;  %796 = vst.msk [vmem:[%s1404_s9 + $0x10] sm:$0xff] %vm793_vm3, %v1079_v35  ;;  %1100 = vrcp.f32 %v757_v33 }
 0x595   :  { %v1083_v39 = vpop.eup %1082  ;;  %804 = vst.msk [vmem:[%s1404_s9 + $0x50] sm:$0xff] %vm793_vm3, %v1081_v38  ;;  %1102 = vrcp.f32 %v752_v36 }
 0x596   :  { %v1085_v40 = vpop.eup %1084  ;;  %794 = vst.msk [vmem:[%s1404_s9] sm:$0xff] %vm793_vm3, %v1083_v39  ;;  %1104 = vpow2.f32 %v878_v34 }
 0x597   :  { %v1087_v41 = vpop.eup %1086  ;;  %802 = vst.msk [vmem:[%s1404_s9 + $0x40] sm:$0xff] %vm793_vm3, %v1085_v40  ;;  %1106 = vpow2.f32 %v868_v37 }
 0x598   :  { %v1089_v42 = vpop.eup %1088  ;;  %797 = vst.msk [vmem:[%s1404_s9 + $0x18] sm:$0xff] %vm793_vm3, %v1087_v41  ;;  %1108 = vpow2.f32 %v876_v26 }
 0x599   :  { %v1091_v43 = vpop.eup %1090  ;;  %805 = vst.msk [vmem:[%s1404_s9 + $0x58] sm:$0xff] %vm793_vm3, %v1089_v42 }
 0x59a   :  { %v1093_v44 = vpop.eup %1092  ;;  %795 = vst.msk [vmem:[%s1404_s9 + $0x8] sm:$0xff] %vm793_vm3, %v1091_v43 }
 0x59b   :  { %v1095_v45 = vpop.eup %1094  ;;  %803 = vst.msk [vmem:[%s1404_s9 + $0x48] sm:$0xff] %vm793_vm3, %v1093_v44 }
 0x59c   :  { %v1097_v46 = vpop.eup %1096  ;;  %800 = vst.msk [vmem:[%s1404_s9 + $0x30] sm:$0xff] %vm793_vm3, %v1095_v45 }
 0x59d   :  { %v1099_v47 = vpop.eup %1098  ;;  %808 = vst.msk [vmem:[%s1404_s9 + $0x70] sm:$0xff] %vm793_vm3, %v1097_v46 }
 0x59e   :  { %v1101_v48 = vpop.eup %1100  ;;  %798 = vst.msk [vmem:[%s1404_s9 + $0x20] sm:$0xff] %vm793_vm3, %v1099_v47 }
 0x59f   :  { %v1103_v49 = vpop.eup %1102  ;;  %806 = vst.msk [vmem:[%s1404_s9 + $0x60] sm:$0xff] %vm793_vm3, %v1101_v48 }
 0x5a0   :  { %v1105_v50 = vpop.eup %1104  ;;  %801 = vst.msk [vmem:[%s1404_s9 + $0x38] sm:$0xff] %vm793_vm3, %v1103_v49 }
 0x5a1   :  { %v1107_v51 = vpop.eup %1106  ;;  %v760_v52 = vadd.f32 1.0, %v1105_v50 }
 0x5a2   :  { %v1109_v53 = vpop.eup %1108  ;;  %v750_v54 = vadd.f32 1.0, %v1107_v51 }
 0x5a3   :  { %1110 = vrcp.f32 %v760_v52  ;;  %v758_v55 = vadd.f32 1.0, %v1109_v53 }
 0x5a4   :  { %1112 = vrcp.f32 %v750_v54 }
 0x5a5   :  { %1114 = vrcp.f32 %v758_v55 }
 0x5ad   :  { %v1111_v56 = vpop.eup %1110 }
 0x5ae   :  { %v1113_v57 = vpop.eup %1112  ;;  %809 = vst.msk [vmem:[%s1404_s9 + $0x78] sm:$0xff] %vm793_vm3, %v1111_v56 }
 0x5af   :  { %v1115_v58 = vpop.eup %1114  ;;  %799 = vst.msk [vmem:[%s1404_s9 + $0x28] sm:$0xff] %vm793_vm3, %v1113_v57 }
 0x5b0   :  { %807 = vst.msk [vmem:[%s1404_s9 + $0x68] sm:$0xff] %vm793_vm3, %v1115_v58 }

</bundles_post_ra>
